<compile_context>
chip_gen: v7x
topology: tpu7x:2x2x1
jax: 0.10.0
libtpu: 0.0.40
codegen_flags: <defaults>
</compile_context>

<pallas_src>
import jax
import jax.numpy as jnp
from jax import lax
from jax.experimental import pallas as pl
from jax.experimental.pallas import tpu as pltpu


def _ia3_attn_kernel(x_ref, wqkv_ref, bqkv_ref, scale_ref, o_ref,
                     q_scr, k_scr, v_scr):
    # x_ref:     (S, H)    hidden states for this batch element
    # wqkv_ref:  (H, 3H)   fused [Wq^T | Wk^T | Wv^T]
    # bqkv_ref:  (1, 3H)   fused [bq | bk | bv]
    # scale_ref: (1, 3H)   fused [1 | l_key | l_value]
    # o_ref:     (TQ, H)   output tile for this (batch, query-tile)
    # *_scr:     (S, H)    per-batch Q/K/V cache (VMEM scratch, carried
    #                      across the query-tile grid axis)
    qi = pl.program_id(1)
    _, h = q_scr.shape
    tq = o_ref.shape[0]

    # --- fused QKV projection: computed once per batch element, cached ---
    @pl.when(qi == 0)
    def _():
        x = x_ref[...]                                       # native dtype
        qkv = jnp.dot(x, wqkv_ref[...],
                      preferred_element_type=jnp.float32)    # (S, 3H) f32 acc
        # fused bias add + IA3 rescale in one broadcast expression
        qkv = (qkv + bqkv_ref[...].astype(jnp.float32)) \
              * scale_ref[...].astype(jnp.float32)
        q_scr[...] = qkv[:, :h].astype(q_scr.dtype)
        k_scr[...] = qkv[:, h:2 * h].astype(k_scr.dtype)
        v_scr[...] = qkv[:, 2 * h:].astype(v_scr.dtype)

    # --- attention for this query tile ---
    q_start = pl.multiple_of(qi * tq, tq)
    q = q_scr[pl.ds(q_start, tq), :]                         # (TQ, H)
    k = k_scr[...]                                           # (S, H)
    v = v_scr[...]                                           # (S, H)

    # scores: contract last dims of q and k (trans_b form, no XLU transpose)
    s = lax.dot_general(q, k, (((1,), (1,)), ((), ())),
                        preferred_element_type=jnp.float32)   # (TQ, S)

    # numerically-stable softmax over keys
    s = s - jnp.max(s, axis=-1, keepdims=True)
    p = jnp.exp(s)
    inv = pl.reciprocal(jnp.sum(p, axis=-1, keepdims=True), approx=False)
    p = p * inv

    ctx = jnp.dot(p.astype(v.dtype), v,
                  preferred_element_type=jnp.float32)         # (TQ, H)
    o_ref[...] = ctx.astype(o_ref.dtype)


def ia3_self_attention(hidden_states, wq, bq, wk, bk, wv, bv, l_key, l_value,
                       *, block_q=128):
    """hidden_states: (B, S, H); w*: (H, H) torch layout (out, in); b*, l_*: (H,)."""
    B, S, H = hidden_states.shape
    dtype = hidden_states.dtype

    # --- fuse the three projections (wrapper-side glue, plain XLA ops) ---
    wqkv = jnp.concatenate([wq.T, wk.T, wv.T], axis=1)             # (H, 3H)
    bqkv = jnp.concatenate([bq, bk, bv]).reshape(1, 3 * H)         # (1, 3H)
    scale = jnp.concatenate(
        [jnp.ones_like(l_key), l_key, l_value]).reshape(1, 3 * H)  # (1, 3H)

    # --- query tiling: TQ must be a multiple of 8 and divide S ---
    tq = min(block_q, S)
    if S % tq != 0 or tq % 8 != 0:
        tq = S                       # fall back to a single query tile
    nq = S // tq

    itemsize = jnp.dtype(dtype).itemsize
    w_itemsize = jnp.dtype(wqkv.dtype).itemsize
    cost = pl.CostEstimate(
        flops=2 * B * S * H * 3 * H + 4 * B * S * S * H,
        transcendentals=B * S * S,
        bytes_accessed=(2 * B * S * H * itemsize              # x + out
                        + 3 * H * H * w_itemsize              # fused weights
                        + 2 * 3 * H * w_itemsize),            # bias + scale
    )

    mat_spec = pl.BlockSpec((H, 3 * H), lambda b, i: (0, 0))
    vec_spec = pl.BlockSpec((1, 3 * H), lambda b, i: (0, 0))

    return pl.pallas_call(
        _ia3_attn_kernel,
        out_shape=jax.ShapeDtypeStruct((B, S, H), dtype),
        grid_spec=pltpu.PrefetchScalarGridSpec(
            num_scalar_prefetch=0,
            grid=(B, nq),
            in_specs=[
                pl.BlockSpec((None, S, H), lambda b, i: (b, 0, 0)),  # x
                mat_spec,   # fused Wqkv^T
                vec_spec,   # fused bias
                vec_spec,   # fused IA3 scale
            ],
            out_specs=pl.BlockSpec((None, tq, H), lambda b, i: (b, i, 0)),
            scratch_shapes=[
                pltpu.VMEM((S, H), dtype),   # q cache
                pltpu.VMEM((S, H), dtype),   # k cache (IA3-scaled)
                pltpu.VMEM((S, H), dtype),   # v cache (IA3-scaled)
            ],
        ),
        compiler_params=pltpu.CompilerParams(
            # batch axis parallel (megacore); query-tile axis must stay
            # "arbitrary" because the Q/K/V scratch is carried across it.
            dimension_semantics=("parallel", "arbitrary")),
        cost_estimate=cost,
    )(hidden_states, wqkv, bqkv, scale)


def _reference(hidden_states, wq, bq, wk, bk, wv, bv, l_key, l_value):
    x = hidden_states.astype(jnp.float32)
    q = x @ wq.T + bq
    k = (x @ wk.T + bk) * l_key
    v = (x @ wv.T + bv) * l_value
    s = jnp.einsum("bqd,bkd->bqk", q, k)
    p = jax.nn.softmax(s, axis=-1)
    return jnp.einsum("bqk,bkd->bqd", p, v)


if __name__ == "__main__":
    # H = 128 keeps the lane dimension dense; block_q=16 exercises the
    # query-tile grid axis (nq = 2 tiles per batch element).
    B, S, H = 2, 32, 128
    key = jax.random.PRNGKey(0)
    kx, kwq, kbq, kwk, kbk, kwv, kbv, klk, klv = jax.random.split(key, 9)

    x = jax.random.normal(kx, (B, S, H), dtype=jnp.float32)

    # deterministic synthetic Linear params (torch layout: weight (out, in))
    wq = 0.05 * jax.random.normal(kwq, (H, H), dtype=jnp.float32)
    bq = 0.01 * jax.random.normal(kbq, (H,), dtype=jnp.float32)
    wk = 0.05 * jax.random.normal(kwk, (H, H), dtype=jnp.float32)
    bk = 0.01 * jax.random.normal(kbk, (H,), dtype=jnp.float32)
    wv = 0.05 * jax.random.normal(kwv, (H, H), dtype=jnp.float32)
    bv = 0.01 * jax.random.normal(kbv, (H,), dtype=jnp.float32)

    # The module initializes l_key / l_value to ones; perturb them here so
    # the IA3 rescaling path is actually exercised by the correctness check.
    l_key = 1.0 + 0.1 * jax.random.normal(klk, (H,), dtype=jnp.float32)
    l_value = 1.0 + 0.1 * jax.random.normal(klv, (H,), dtype=jnp.float32)

    out = ia3_self_attention(x, wq, bq, wk, bk, wv, bv, l_key, l_value,
                             block_q=16)
    out = jax.block_until_ready(out)

    ref = _reference(x, wq, bq, wk, bk, wv, bv, l_key, l_value)
    assert out.shape == (B, S, H)
    assert jnp.allclose(out, ref, atol=1e-4, rtol=1e-4), "mismatch vs reference"

    print("KERNEL_OK")
</pallas_src>

<mosaic_0001>
module attributes {stable_mosaic.version = 11 : i64} {
  func.func @_ia3_attn_kernel(%arg0: i32, %arg1: i32, %arg2: memref<1x32x128xf32, #tpu.memory_space<vmem>>, %arg3: memref<128x384xf32, #tpu.memory_space<vmem>>, %arg4: memref<1x384xf32, #tpu.memory_space<vmem>>, %arg5: memref<1x384xf32, #tpu.memory_space<vmem>>, %arg6: memref<1x16x128xf32, #tpu.memory_space<vmem>>, %arg7: memref<32x128xf32, #tpu.memory_space<vmem>>, %arg8: memref<32x128xf32, #tpu.memory_space<vmem>>, %arg9: memref<32x128xf32, #tpu.memory_space<vmem>>) attributes {dimension_semantics = [#tpu.dimension_semantics<parallel>, #tpu.dimension_semantics<arbitrary>], iteration_bounds = array<i64: 2, 2>, scalar_prefetch = 0 : i64, scratch_operands = 3 : i64, tpu.core_type = #tpu.core_type<tc>, window_params = [{transform_indices = @transform_0, window_bounds = array<i64: 1, 32, 128>}, {pipeline_mode = #tpu.pipeline_mode<synchronous>, transform_indices = @transform_1, window_bounds = array<i64: 128, 384>}, {pipeline_mode = #tpu.pipeline_mode<synchronous>, transform_indices = @transform_2, window_bounds = array<i64: 1, 384>}, {pipeline_mode = #tpu.pipeline_mode<synchronous>, transform_indices = @transform_3, window_bounds = array<i64: 1, 384>}, {transform_indices = @transform_4, window_bounds = array<i64: 1, 16, 128>}]} {
    %c0_i32 = arith.constant 0 : i32
    %0 = arith.cmpi eq, %arg1, %c0_i32 : i32
    %1 = arith.extui %0 : i1 to i32
    %c0_i32_0 = arith.constant 0 : i32
    %2 = arith.cmpi ne, %1, %c0_i32_0 : i32
    scf.if %2 {
      %c0_11 = arith.constant 0 : index
      %c0_12 = arith.constant 0 : index
      %c0_13 = arith.constant 0 : index
      %24 = vector.load %arg2[%c0_11, %c0_12, %c0_13] : memref<1x32x128xf32, #tpu.memory_space<vmem>>, vector<1x32x128xf32>
      %25 = vector.shape_cast %24 : vector<1x32x128xf32> to vector<32x128xf32>
      %c0_14 = arith.constant 0 : index
      %c0_15 = arith.constant 0 : index
      %26 = vector.load %arg3[%c0_14, %c0_15] : memref<128x384xf32, #tpu.memory_space<vmem>>, vector<128x384xf32>
      %cst_16 = arith.constant dense<0.000000e+00> : vector<32x384xf32>
      %27 = tpu.matmul %25, %26, %cst_16 {dimension_numbers = #tpu.dot_dimension_numbers<[1], [0], [0], [1], [0, 0, 1, 1], [], []>} : vector<32x128xf32>, vector<128x384xf32>, vector<32x384xf32> -> vector<32x384xf32>
      %c0_17 = arith.constant 0 : index
      %c0_18 = arith.constant 0 : index
      %28 = vector.load %arg4[%c0_17, %c0_18] : memref<1x384xf32, #tpu.memory_space<vmem>>, vector<1x384xf32>
      %29 = vector.broadcast %28 : vector<1x384xf32> to vector<32x384xf32>
      %30 = arith.addf %27, %29 : vector<32x384xf32>
      %c0_19 = arith.constant 0 : index
      %c0_20 = arith.constant 0 : index
      %31 = vector.load %arg5[%c0_19, %c0_20] : memref<1x384xf32, #tpu.memory_space<vmem>>, vector<1x384xf32>
      %32 = vector.broadcast %31 : vector<1x384xf32> to vector<32x384xf32>
      %33 = arith.mulf %30, %32 : vector<32x384xf32>
      %34 = vector.extract_strided_slice %33 {offsets = [0, 0], sizes = [32, 128], strides = [1, 1]} : vector<32x384xf32> to vector<32x128xf32>
      %c0_21 = arith.constant 0 : index
      %c0_22 = arith.constant 0 : index
      %35 = vector.load %arg7[%c0_21, %c0_22] : memref<32x128xf32, #tpu.memory_space<vmem>>, vector<32x128xf32>
      tpu.vector_store %arg7[%c0_21, %c0_22], %34 {strides = array<i32>} : memref<32x128xf32, #tpu.memory_space<vmem>>, vector<32x128xf32>,
      %36 = vector.extract_strided_slice %33 {offsets = [0, 128], sizes = [32, 128], strides = [1, 1]} : vector<32x384xf32> to vector<32x128xf32>
      %c0_23 = arith.constant 0 : index
      %c0_24 = arith.constant 0 : index
      %37 = vector.load %arg8[%c0_23, %c0_24] : memref<32x128xf32, #tpu.memory_space<vmem>>, vector<32x128xf32>
      tpu.vector_store %arg8[%c0_23, %c0_24], %36 {strides = array<i32>} : memref<32x128xf32, #tpu.memory_space<vmem>>, vector<32x128xf32>,
      %38 = vector.extract_strided_slice %33 {offsets = [0, 256], sizes = [32, 128], strides = [1, 1]} : vector<32x384xf32> to vector<32x128xf32>
      %c0_25 = arith.constant 0 : index
      %c0_26 = arith.constant 0 : index
      %39 = vector.load %arg9[%c0_25, %c0_26] : memref<32x128xf32, #tpu.memory_space<vmem>>, vector<32x128xf32>
      tpu.vector_store %arg9[%c0_25, %c0_26], %38 {strides = array<i32>} : memref<32x128xf32, #tpu.memory_space<vmem>>, vector<32x128xf32>,
    } else {
    }
    %c16_i32 = arith.constant 16 : i32
    %3 = arith.muli %arg1, %c16_i32 : i32
    %4 = tpu.assume_multiple %3, 16 : i32
    %5 = arith.index_cast %4 : i32 to index
    %c0 = arith.constant 0 : index
    %6 = vector.load %arg7[%5, %c0] : memref<32x128xf32, #tpu.memory_space<vmem>>, vector<16x128xf32>
    %c0_1 = arith.constant 0 : index
    %c0_2 = arith.constant 0 : index
    %7 = vector.load %arg8[%c0_1, %c0_2] : memref<32x128xf32, #tpu.memory_space<vmem>>, vector<32x128xf32>
    %c0_3 = arith.constant 0 : index
    %c0_4 = arith.constant 0 : index
    %8 = vector.load %arg9[%c0_3, %c0_4] : memref<32x128xf32, #tpu.memory_space<vmem>>, vector<32x128xf32>
    %cst = arith.constant dense<0.000000e+00> : vector<16x32xf32>
    %9 = tpu.matmul %6, %7, %cst {dimension_numbers = #tpu.dot_dimension_numbers<[1], [1], [0], [0], [0, 0, 1, 0], [], []>} : vector<16x128xf32>, vector<32x128xf32>, vector<16x32xf32> -> vector<16x32xf32>
    %cst_5 = arith.constant dense<0xFF800000> : vector<16xf32>
    %10 = vector.multi_reduction <maximumf>, %9, %cst_5 [1] : vector<16x32xf32> to vector<16xf32>
    %11 = vector.shape_cast %10 : vector<16xf32> to vector<16x1xf32>
    %12 = vector.broadcast %11 : vector<16x1xf32> to vector<16x32xf32>
    %13 = arith.subf %9, %12 : vector<16x32xf32>
    %14 = math.exp %13 : vector<16x32xf32>
    %cst_6 = arith.constant dense<0.000000e+00> : vector<16xf32>
    %15 = vector.multi_reduction <add>, %14, %cst_6 [1] : vector<16x32xf32> to vector<16xf32>
    %16 = vector.shape_cast %15 : vector<16xf32> to vector<16x1xf32>
    %17 = tpu.reciprocal %16 : vector<16x1xf32> -> vector<16x1xf32>
    %18 = vector.broadcast %17 : vector<16x1xf32> to vector<16x32xf32>
    %19 = arith.mulf %14, %18 : vector<16x32xf32>
    %cst_7 = arith.constant dense<0.000000e+00> : vector<16x128xf32>
    %20 = tpu.matmul %19, %8, %cst_7 {dimension_numbers = #tpu.dot_dimension_numbers<[1], [0], [0], [1], [0, 0, 1, 1], [], []>} : vector<16x32xf32>, vector<32x128xf32>, vector<16x128xf32> -> vector<16x128xf32>
    %c0_8 = arith.constant 0 : index
    %c0_9 = arith.constant 0 : index
    %c0_10 = arith.constant 0 : index
    %21 = vector.load %arg6[%c0_8, %c0_9, %c0_10] : memref<1x16x128xf32, #tpu.memory_space<vmem>>, vector<1x16x128xf32>
    %22 = vector.shape_cast %21 : vector<1x16x128xf32> to vector<16x128xf32>
    %23 = vector.shape_cast %20 : vector<16x128xf32> to vector<1x16x128xf32>
    tpu.vector_store %arg6[%c0_8, %c0_9, %c0_10], %23 {strides = array<i32>} : memref<1x16x128xf32, #tpu.memory_space<vmem>>, vector<1x16x128xf32>,
    return
  }
  func.func @transform_0(%arg0: i32, %arg1: i32) -> (i32, i32, i32) {
    %c0_i32 = arith.constant 0 : i32
    %c0_i32_0 = arith.constant 0 : i32
    %c0_i32_1 = arith.constant 0 : i32
    return %arg0, %c0_i32, %c0_i32_0 : i32, i32, i32
  }
  func.func @transform_1(%arg0: i32, %arg1: i32) -> (i32, i32) {
    %c0_i32 = arith.constant 0 : i32
    %c0_i32_0 = arith.constant 0 : i32
    %c0_i32_1 = arith.constant 0 : i32
    return %c0_i32, %c0_i32_0 : i32, i32
  }
  func.func @transform_2(%arg0: i32, %arg1: i32) -> (i32, i32) {
    %c0_i32 = arith.constant 0 : i32
    %c0_i32_0 = arith.constant 0 : i32
    %c0_i32_1 = arith.constant 0 : i32
    return %c0_i32, %c0_i32_0 : i32, i32
  }
  func.func @transform_3(%arg0: i32, %arg1: i32) -> (i32, i32) {
    %c0_i32 = arith.constant 0 : i32
    %c0_i32_0 = arith.constant 0 : i32
    %c0_i32_1 = arith.constant 0 : i32
    return %c0_i32, %c0_i32_0 : i32, i32
  }
  func.func @transform_4(%arg0: i32, %arg1: i32) -> (i32, i32, i32) {
    %c0_i32 = arith.constant 0 : i32
    %c0_i32_0 = arith.constant 0 : i32
    return %arg0, %arg1, %c0_i32 : i32, i32, i32
  }
}

</mosaic_0001>

<bundles_post_ra>
// kernel: tpu_custom_call.1
= control target key start
LH: loop header
LB: loop body
LE: loop exit
PB: predicated region body
PF: predicated region fallthrough
CT: control target
= control target key end

     0   :  { %s1683_s0 = inlined_call_operand.hbm [shape: f32[2,32,128], index: 0, kind: input, shape index: {}]   ;;  %s1684_s1 = inlined_call_operand.hbm [shape: f32[128,384], index: 1, kind: input, shape index: {}]   ;;  %s1685_s2 = inlined_call_operand.vmem [shape: f32[1,384], index: 2, kind: input, shape index: {}]   ;;  %s1686_s3 = inlined_call_operand.vmem [shape: f32[1,384], index: 3, kind: input, shape index: {}]   ;;  %s1687_s4 = inlined_call_operand.hbm [shape: f32[2,32,128], index: 4, kind: output, shape index: {}]  }
   0x1   :  { %1699 = sst [smem:[#allocation19_spill]] %s1684_s1 }
   0x2   :  { %1700 = sst [smem:[#allocation20_spill]] %s1687_s4 }
   0x3   :  { %9 = vsyncpa [#allocation6], 0 }
   0x4   :  { %11 = vsyncpa [#allocation6 + $0x1], 0 }
   0x5   :  { %12 = vsyncpa [#allocation9], 0 }
   0x6   :  { %13 = vsyncpa [#allocation7], 0 }
   0x7   :  { %15 = vsyncpa [#allocation7 + $0x1], 0  ;;  %s1386_s15 = smov 0   ;;  %s1388_s16 = smov 0  }
   0x8   :  { %s1390_s17 = smov 0   ;;  %s1392_s18 = smov 0  }
   0x9   :  { %s1394_s19 = smov 0   ;;  %s1396_s20 = smov 0  }
   0xa   :  { %s1398_s21 = smov 0   ;;  %s1400_s22 = smov 0  }
   0xb   :  { %s1402_s23 = smov 0   ;;  %s1404_s24 = smov 0  }
   0xc   :  { %s1406_s25 = smov 0  }
   0xd LB: > { %1701 = sst [smem:[#allocation14_spill]] %s1309_s15  ;;  %s842_s26 = sadd.s32 4294967295, %s1349_s25   ;;  %s1349_s25 = sphi %s1406_s25, %s21_s25   ;;  %s1345_s24 = sphi %s1404_s24, %s1734_s24   ;;  %s1341_s23 = sphi %s1402_s23, %s1725_s23   ;;  %s1337_s22 = sphi %s1400_s22, %s1733_s22   ;;  %s1333_s21 = sphi %s1398_s21, %s1724_s21   ;;  %s1329_s20 = sphi %s1396_s20, %s1732_s20   ;;  %s1325_s19 = sphi %s1394_s19, %s1731_s19   ;;  %s1321_s18 = sphi %s1392_s18, %s1730_s18   ;;  %s1317_s17 = sphi %s1390_s17, %s1729_s17   ;;  %s1313_s16 = sphi %s1388_s16, %s1728_s16   ;;  %s1309_s15 = sphi %s1386_s15, %s1727_s15  }
   0xe   : > { %1702 = sst [smem:[#allocation15_spill]] %s1341_s23  ;;  %s843_s27 = sadd.s32 4294967294, %s1349_s25  }
   0xf   : > { %p53_p0 = scmp.ne.s32.totalorder %s1325_s19, %s1321_s18  ;;  %p1442_p1 = scmp.eq.s32.totalorder %s842_s26, 0 }
  0x10   : > { %p141_p2 = scmp.ne.s32.totalorder %s1317_s17, %s1313_s16  ;;  %p142_p4 = scmp.eq.s32.totalorder %s842_s26, 3 }
  0x11   : > { %s1703_s28 = scalar_select %p1442_p1, 1, 0 }
  0x12   : > { %p1451_p3 = por %p1442_p1, %p53_p0  ;;  %p147_p5 = scmp.ne.s32.totalorder %s1313_s16, %s1309_s15 }
  0x13   : > { %p148_p6 = scmp.eq.s32.totalorder %s843_s27, 3  ;;  %p1457_p7 = por %p142_p4, %p141_p2 }
  0x14   : > { %s1704_s30 = scalar_select %p1451_p3, 1, 0 }
  0x15   : > { %s1705_s5 = scalar_select %p1457_p7, 1, 0 }
  0x16   : > { %p844_p8 = scmp.ge.s32.totalorder %s1349_s25, 1  ;;  %p1462_p9 = por %p148_p6, %p147_p5 }
  0x17   : > { %p155_p10 = scmp.lt.s32.totalorder %s1349_s25, 5  ;;  %s1351_s8 = smov [#allocation8]  }
  0x18   : > { %s1706_s6 = scalar_select %p1462_p9, 1, 0 }
  0x19   : > { %p1467_p11 = pnand %p844_p8, %p155_p10  ;;  %s167_s9 = sshll.u32 %s1351_s8, 4  ;;  %s168_s9 = int_to_ptr.vmem [resolvable:$true] %s167_s9 }
  0x1a   : > { %1707 = sst [smem:[#allocation16_spill]] %s1706_s6  ;;  %s1710_s1 = sld [smem:[#allocation19_spill]] }
  0x1b   : > { %s1708_s7 = scalar_select %p1467_p11, 1, 0 }
  0x1c   : > { %p1045_p12 = pneg %p1467_p11 }
  0x1e   : > { %p1475_p13 = pnand %p1045_p12, %p1442_p1 }
  0x20   : > { %s1165_s13 = scalar_lea.hbm %s1710_s1, 6144  ;;  %p1167_p2 = pneg %p1475_p13 }
  0x21   : > { %p1166_p0 = scmp.ne.s32.totalorder %s1710_s1, %s1165_s13  ;;  %p1172_p6 = scmp.lt.u32.totalorder %s1165_s13, %s1710_s1 }
  0x23   : > { %p1168_p4 = pnand %p1167_p2, %p1166_p0 }
  0x25   : > { %p1169_p5 = pneg %p1168_p4 }
  0x27   : > { %p1174_p8 = pnand %p1172_p6, %p1169_p5 }
  0x29   : > { %1177 = shalt.err (!%p1174_p8)
}
  0x2a   : > { %s1178_s8 = scalar_lea.vmem %s168_s9, 6144  ;;  %p1186_p7 = scmp.lt.s32.totalorder %s168_s9, %s168_s9 }
  0x2b   : > { %p1179_p10 = scmp.ne.s32.totalorder %s168_s9, %s1178_s8  ;;  %p1187_p1 = scmp.lt.s32.totalorder %s1178_s8, %s1178_s8 }
  0x2d   : > { %p1181_p12 = pnand %p1179_p10, %p1167_p2  ;;  %p1188_p3 = por %p1187_p1, %p1186_p7 }
  0x2f   : > { %p1182_p9 = pneg %p1181_p12 }
  0x31   : > { %p1189_p11 = pnand %p1188_p3, %p1182_p9 }
  0x33   : > { %1192 = shalt.err (!%p1189_p11)
}
  0x34   : > { %s1352_s11 = smov 384   ;;  %s1353_s12 = smov 24  }
  0x35   : > { %1048 = dma.hbm_to_vmem [thread:$0]  (!%p1475_p13), %s1710_s1, 6144, %s168_s9, [#allocation9], %s1352_s11, %s1352_s11, %s1353_s12  }
  0x36   : > { %s30_s18 = sadd.s32 1, %s1341_s23  ;;  %s33_s26 = sadd.s32 1, %s1345_s24 }
  0x37   : > { %p31_p1 = scmp.ge.s32.totalorder %s30_s18, 2  ;;  %s40_s27 = sadd.s32 1, %s1329_s20 }
  0x38   : > { %p47_p3 = scmp.ne.s32.totalorder %s1329_s20, %s1325_s19  ;;  %p48_p7 = scmp.eq.s32.totalorder %s1349_s25, 0 }
  0x39   : > { %s1736_s18 = smov (%p31_p1, %s30_s18), 0  ;;  %s1738_s26 = smov (!%p31_p1, %s33_s26), %s1345_s24 }
  0x3a   : > { %1711 = sst [smem:[#allocation17_spill]] %s1736_s18  ;;  %s127_s10 = ssub.s32 %s1341_s23, %s1736_s18 }
  0x3b   : > { %p35_p9 = scmp.ge.s32.totalorder %s1738_s26, 2  ;;  %p1058_p11 = scmp.lt.s32.totalorder %s1349_s25, 4 }
  0x3c   : > { %p1507_p13 = por %p48_p7, %p47_p3  ;;  %s187_s8 = sand.u32 1, %s1329_s20  }
  0x3d   : > { %s1740_s26 = smov (%p35_p9, %s1738_s26), 0  ;;  %s847_s11 = sshll.u32 %s187_s8, 5 }
  0x3e   : > { %1713 = sst [smem:[#allocation18_spill]] %s1740_s26  ;;  %s37_s12 = ssub.s32 %s1345_s24, %s1740_s26 }
  0x3f   : > { %p38_p0 = scmp.eq.s32.totalorder %s37_s12, 0  ;;  %s128_s13 = sor.u32 %s127_s10, %s37_s12 }
  0x40   : > { %p129_p2 = scmp.eq.s32.totalorder %s128_s13, 0  ;;  %s864_s14 = sshll.u32 %s1345_s24, 9 }
  0x41   : > { %s1518_s29 = scalar_select %p38_p0, %s1329_s20, %s40_s27  }
  0x42   : > { %s1714_s1 = sadd.s32 1, %s1317_s17  ;;  %s1528_s15 = scalar_lea.hbm %s1683_s0, %s864_s14 }
  0x43   : > { %s1523_s18 = scalar_select %p129_p2, %s1317_s17, %s1714_s1  }
  0x44   : > { %s191_s4 = scalar_lea.vmem [#allocation5], %s847_s11  ;;  %p1536_p4 = pnand %p1058_p11, %p1507_p13 }
  0x45   : > { %s198_s26 = sshll.u32 %s191_s4, 4  ;;  %s1540_s1 = scalar_lea.sflag [#allocation6], %s187_s8  ;;  %s1530_s26 = int_to_ptr.vmem [resolvable:$true] %s198_s26 }
  0x46   : > { %s1193_s23 = scalar_lea.hbm %s1528_s15, 512  ;;  %p1195_p6 = pneg %p1536_p4 }
  0x47   : > { %p1194_p5 = scmp.ne.s32.totalorder %s1528_s15, %s1193_s23  ;;  %s1198_s10 = scalar_lea.hbm %s1683_s0, 1024 }
  0x48   : > { %p1199_p12 = scmp.lt.u32.totalorder %s1528_s15, %s1683_s0  ;;  %p1200_p1 = scmp.lt.u32.totalorder %s1198_s10, %s1193_s23 }
  0x49   : > { %p1196_p8 = pnand %p1195_p6, %p1194_p5  ;;  %p1202_p7 = scmp.lt.u32.totalorder %s1193_s23, %s1528_s15 }
  0x4a   : > { %p1201_p3 = por %p1200_p1, %p1199_p12 }
  0x4b   : > { %p1197_p10 = pneg %p1196_p8 }
  0x4c   : > { %p1203_p9 = por %p1202_p7, %p1201_p3 }
  0x4e   : > { %p1204_p11 = pnand %p1203_p9, %p1197_p10 }
  0x50   : > { %1207 = shalt.err (!%p1204_p11)
}
  0x51   : > { %s1208_s8 = scalar_lea.vmem %s1530_s26, 512  ;;  %s1354_s12 = smov [#allocation5]  }
  0x52   : > { %p1209_p13 = scmp.ne.s32.totalorder %s1530_s26, %s1208_s8  ;;  %s1213_s13 = sshll.u32 %s1354_s12, 4  ;;  %s1214_s13 = int_to_ptr.vmem [resolvable:$false] %s1213_s13 }
  0x53   : > { %s1215_s14 = scalar_lea.vmem %s1214_s13, 1024  ;;  %p1216_p5 = scmp.lt.s32.totalorder %s1530_s26, %s1214_s13 }
  0x54   : > { %p1211_p0 = pnand %p1209_p13, %p1195_p6  ;;  %p1217_p8 = scmp.lt.s32.totalorder %s1215_s14, %s1208_s8 }
  0x56   : > { %p1212_p2 = pneg %p1211_p0  ;;  %p1218_p12 = por %p1217_p8, %p1216_p5 }
  0x58   : > { %p1219_p1 = pnand %p1218_p12, %p1212_p2 }
  0x5a   : > { %1222 = shalt.err (!%p1219_p1)
}
  0x5b   : > { %s1355_s23 = smov 128   ;;  %s1356_s4 = smov 8  }
  0x5c   : > { %1052 = dma.hbm_to_vmem [thread:$0]  (!%p1536_p4), %s1528_s15, 512, %s1530_s26, %s1540_s1, %s1355_s23, %s1355_s23, %s1356_s4  }
  0x5d   : > { %p1716_p6 = scmp.ne.s32.totalorder %s1708_s7, 0 }
  0x5e   : > { %s212_s6 = sand.u32 (!%p1716_p6), 1, %s1325_s19   ;;  %p1717_p10 = scmp.ne.s32.totalorder (!%p1716_p6), %s1704_s30, 0 }
  0x5f   : > { %210 = sbr.rel (%p1716_p6) target bundleno = 1150 (0x47e), region = 36  ;;  %s851_s10 = sshll.u32 (!%p1716_p6), %s212_s6, 5 }
  0x60   : > { %s213_s9 = scalar_lea.sflag (!%p1716_p6), [#allocation6], %s212_s6  ;;  %s1571_s11 = scalar_lea.vmem (!%p1716_p6), [#allocation5], %s851_s10 }
  0x66   : > { %1296 = dma.done.wait (%p1717_p10), %s213_s9, 512  }
  0x67   : > { %1298 = vsyncadd (%p1717_p10), %s213_s9, 4294966784  ;;  %p1718_p3 = scmp.ne.s32.totalorder %s1703_s28, 0 }
  0x69   : > { %1300 = dma.done.wait (%p1718_p3), [#allocation9], 6144  }
  0x6a   : > { %1302 = vsyncadd (%p1718_p3), [#allocation9], 4294961152  ;;  %s242_s15 = sand.u32 1, %s1313_s16   ;;  %p854_p4 = scmp.ne.s32.totalorder %s1333_s21, 0 }
  0x6b   : > { %s853_s7 = sshll.u32 %s242_s15, 4  ;;  %v255_v0 = vld [vmem:[#allocation8 + $0x8] sm:$0xff] (!%p854_p4)  ;;  %v258_v1 = vld [vmem:[#allocation8 + $0x20] sm:$0xff] (!%p854_p4)  ;;  %v257_v4 = vld [vmem:[#allocation8 + $0x18] sm:$0xff] (!%p854_p4)  ;;  %v1357_v7 = vmov (!%p854_p4), 0.0  }
  0x6c   : > { %s1584_s26 = scalar_lea.vmem [#allocation10], %s853_s7  ;;  %249 = sbr.rel (%p854_p4) target bundleno = 372 (0x174), region = 48  ;;  %v254_v2 = vld [vmem:[#allocation8] sm:$0xff] (!%p854_p4)  ;;  %v957_v3 = vpack.c.bf16 (!%p854_p4), %v258_v1, %v255_v0  ;;  %v261_v5 = vld [vmem:[#allocation8 + $0x38] sm:$0xff] (!%p854_p4)  ;;  %v264_v6 = vld [vmem:[#allocation8 + $0x50] sm:$0xff] (!%p854_p4)  ;;  %383 = vmatprep.mubr.f32.mxu0 (!%p854_p4), %v1357_v7 }
  0x6d   : > { %v959_v8 = vpack.c.bf16 (!%p854_p4), %v257_v4, %v254_v2  ;;  %v961_v9 = vpack.c.bf16 (!%p854_p4), %v264_v6, %v261_v5  ;;  %v260_v10 = vld [vmem:[#allocation8 + $0x30] sm:$0xff] (!%p854_p4)  ;;  %v263_v11 = vld [vmem:[#allocation8 + $0x48] sm:$0xff] (!%p854_p4)  ;;  %v270_v15 = vld [vmem:[#allocation8 + $0x80] sm:$0xff] (!%p854_p4) }
  0x6e   : > { %v256_v12 = vld [vmem:[#allocation8 + $0x10] sm:$0xff] (!%p854_p4)  ;;  %958 = vmatprep.subr.bf16.mxu0 (!%p854_p4), %v957_v3  ;;  %v259_v13 = vld [vmem:[#allocation8 + $0x28] sm:$0xff] (!%p854_p4)  ;;  %v963_v16 = vpack.c.bf16 (!%p854_p4), %v263_v11, %v260_v10  ;;  %v262_v18 = vld [vmem:[#allocation8 + $0x40] sm:$0xff] (!%p854_p4) }
  0x6f   : > { %v267_v14 = vld [vmem:[#allocation8 + $0x68] sm:$0xff] (!%p854_p4)  ;;  %960 = vmatpush1.bf16.msra.mxu0 (!%p854_p4), %v959_v8  ;;  %v989_v17 = vpack.c.bf16 (!%p854_p4), %v259_v13, %v256_v12  ;;  %v266_v20 = vld [vmem:[#allocation8 + $0x60] sm:$0xff] (!%p854_p4)  ;;  %v269_v21 = vld [vmem:[#allocation8 + $0x78] sm:$0xff] (!%p854_p4) }
  0x70   : > { %962 = vmatprep.subr.bf16.mxu0 (!%p854_p4), %v961_v9  ;;  %v965_v19 = vpack.c.bf16 (!%p854_p4), %v270_v15, %v267_v14  ;;  %v265_v22 = vld [vmem:[#allocation8 + $0x58] sm:$0xff] (!%p854_p4)  ;;  %v276_v25 = vld [vmem:[#allocation8 + $0xb0] sm:$0xff] (!%p854_p4)  ;;  %v271_v27 = vld [vmem:[#allocation8 + $0x88] sm:$0xff] (!%p854_p4)  ;;  %v967_v28 = vpack.c.bf16 (!%p854_p4), %v269_v21, %v266_v20  ;;  %v304_v14 = vlaneseq (!%p854_p4) }
  0x71   : > { %990 = vmatprep.subr.bf16.mxu1 (!%p854_p4), %v989_v17  ;;  %v993_v23 = vpack.c.bf16 (!%p854_p4), %v265_v22, %v262_v18  ;;  %v273_v24 = vld [vmem:[#allocation8 + $0x98] sm:$0xff] (!%p854_p4)  ;;  %v268_v26 = vld [vmem:[#allocation8 + $0x70] sm:$0xff] (!%p854_p4)  ;;  %v275_v32 = vld [vmem:[#allocation8 + $0xa8] sm:$0xff] (!%p854_p4) }
  0x72   : > { %992 = vmatpush3.bf16.msra.mxu1 (!%p854_p4), %v989_v17  ;;  %v272_v29 = vld [vmem:[#allocation8 + $0x90] sm:$0xff] (!%p854_p4)  ;;  %v997_v30 = vpack.c.bf16 (!%p854_p4), %v271_v27, %v268_v26  ;;  %v969_v31 = vpack.c.bf16 (!%p854_p4), %v276_v25, %v273_v24  ;;  %v274_v33 = vld [vmem:[#allocation8 + $0xa0] sm:$0xff] (!%p854_p4)  ;;  %v277_v34 = vld [vmem:[#allocation8 + $0xb8] sm:$0xff] (!%p854_p4)  ;;  %v305_v15 = vshrl.u32 (!%p854_p4), %v304_v14, 7 }
  0x73   : > { %964 = vmatpush1.bf16.msra.mxu0 %v963_v16  ;;  %994 = vmatprep.subr.bf16.mxu1 %v993_v23  ;;  %v279_v35 = vld [vmem:[#allocation8 + $0xc8] sm:$0xff]  ;;  %v282_v36 = vld [vmem:[#allocation8 + $0xe0] sm:$0xff]  ;;  %v971_v37 = vpack.c.bf16 %v275_v32, %v272_v29  ;;  %v1001_v39 = vpack.c.bf16 %v277_v34, %v274_v33  ;;  %v281_v41 = vld [vmem:[#allocation8 + $0xd8] sm:$0xff] }
  0x74   : > { %966 = vmatprep.subr.bf16.mxu0 %v965_v19  ;;  %v278_v38 = vld [vmem:[#allocation8 + $0xc0] sm:$0xff]  ;;  %v973_v40 = vpack.c.bf16 %v282_v36, %v279_v35  ;;  %v280_v42 = vld [vmem:[#allocation8 + $0xd0] sm:$0xff]  ;;  %v283_v43 = vld [vmem:[#allocation8 + $0xe8] sm:$0xff]  ;;  %v306_v16 = vsub.s32 0, %v305_v15  ;;  %v310_v18 = vsub.s32 1, %v305_v15  ;;  %v314_v20 = vsub.s32 2, %v305_v15 }
  0x75   : > { %v285_v44 = vld [vmem:[#allocation8 + $0xf8] sm:$0xff]  ;;  %v288_v45 = vld [vmem:[#allocation8 + $0x110] sm:$0xff]  ;;  %v975_v46 = vpack.c.bf16 %v281_v41, %v278_v38  ;;  %v1005_v48 = vpack.c.bf16 %v283_v43, %v280_v42  ;;  %v250_v49 = vld [vmem:[%s1571_s11] sm:$0xff] }
  0x76   : > { %996 = vmatpush3.bf16.msra.mxu1 %v993_v23  ;;  %v284_v47 = vld [vmem:[#allocation8 + $0xf0] sm:$0xff]  ;;  %v977_v50 = vpack.c.bf16 %v288_v45, %v285_v44  ;;  %v287_v51 = vld [vmem:[#allocation8 + $0x108] sm:$0xff]  ;;  %v286_v52 = vld [vmem:[#allocation8 + $0x100] sm:$0xff]  ;;  %929 = vmatprep.mubr.f32.mxu1 %v250_v49 }
  0x77   : > { %968 = vmatpush1.bf16.msra.mxu0 %v967_v28  ;;  %998 = vmatprep.subr.bf16.mxu1 %v997_v30  ;;  %v289_v53 = vld [vmem:[#allocation8 + $0x118] sm:$0xff]  ;;  %v291_v54 = vld [vmem:[#allocation8 + $0x128] sm:$0xff]  ;;  %v294_v55 = vld [vmem:[#allocation8 + $0x140] sm:$0xff]  ;;  %v979_v56 = vpack.c.bf16 %v287_v51, %v284_v47 }
  0x78   : > { %970 = vmatprep.subr.bf16.mxu0 %v969_v31  ;;  %v290_v57 = vld [vmem:[#allocation8 + $0x120] sm:$0xff]  ;;  %v1009_v58 = vpack.c.bf16 %v289_v53, %v286_v52  ;;  %v981_v59 = vpack.c.bf16 %v294_v55, %v291_v54  ;;  %v293_v60 = vld [vmem:[#allocation8 + $0x138] sm:$0xff]  ;;  %v292_v61 = vld [vmem:[#allocation8 + $0x130] sm:$0xff] }
  0x79   : > { %v295_v62 = vld [vmem:[#allocation8 + $0x148] sm:$0xff]  ;;  %v297_v63 = vld [vmem:[#allocation8 + $0x158] sm:$0xff]  ;;  %v300_v0 = vld [vmem:[#allocation8 + $0x170] sm:$0xff]  ;;  %v983_v1 = vpack.c.bf16 %v293_v60, %v290_v57 }
  0x7a   : > { %1000 = vmatpush3.bf16.msra.mxu1 %v997_v30  ;;  %v296_v2 = vld [vmem:[#allocation8 + $0x150] sm:$0xff]  ;;  %v1013_v3 = vpack.c.bf16 %v295_v62, %v292_v61  ;;  %v985_v4 = vpack.c.bf16 %v300_v0, %v297_v63  ;;  %v299_v5 = vld [vmem:[#allocation8 + $0x168] sm:$0xff]  ;;  %v298_v6 = vld [vmem:[#allocation8 + $0x160] sm:$0xff] }
  0x7b   : > { %972 = vmatpush1.bf16.msra.mxu0 %v971_v37  ;;  %1002 = vmatprep.subr.bf16.mxu1 %v1001_v39  ;;  %v301_v8 = vld [vmem:[#allocation8 + $0x178] sm:$0xff]  ;;  %v987_v9 = vpack.c.bf16 %v299_v5, %v296_v2  ;;  %v251_v11 = vld [vmem:[%s1571_s11 + $0x8] sm:$0xff]  ;;  %v252_v12 = vld [vmem:[%s1571_s11 + $0x10] sm:$0xff] }
  0x7c   : > { %974 = vmatprep.subr.bf16.mxu0 %v973_v40  ;;  %v1017_v10 = vpack.c.bf16 %v301_v8, %v298_v6  ;;  %v253_v13 = vld [vmem:[%s1571_s11 + $0x18] sm:$0xff]  ;;  %v302_v17 = vld [vmem:[%s1685_s2] sm:$0x7] }
  0x7d   : > { %v493_v19 = vld [vmem:[%s1686_s3] sm:$0x7]  ;;  %v307_v21 = vrot.slane %v302_v17, %v306_v16  ;;  %v311_v22 = vrot.slane %v302_v17, %v310_v18 }
  0x7e   : > { %1004 = vmatpush3.bf16.msra.mxu1 %v1001_v39  ;;  %v498_v23 = vrot.slane %v493_v19, %v306_v16  ;;  %v502_v25 = vrot.slane %v493_v19, %v310_v18  ;;  %v506_v29 = vrot.slane %v493_v19, %v314_v20 }
  0x7f   : > { %976 = vmatpush1.bf16.msra.mxu0 %v975_v46  ;;  %1006 = vmatprep.subr.bf16.mxu1 %v1005_v48 }
  0x80   : > { %978 = vmatprep.subr.bf16.mxu0 %v977_v50 }
  0x82   : > { %1008 = vmatpush3.bf16.msra.mxu1 %v1005_v48 }
  0x83   : > { %980 = vmatpush1.bf16.msra.mxu0 %v979_v56  ;;  %1010 = vmatprep.subr.bf16.mxu1 %v1009_v58 }
  0x84   : > { %982 = vmatprep.subr.bf16.mxu0 %v981_v59 }
  0x86   : > { %1012 = vmatpush3.bf16.msra.mxu1 %v1009_v58 }
  0x87   : > { %984 = vmatpush1.bf16.msra.mxu0 %v983_v1  ;;  %1014 = vmatprep.subr.bf16.mxu1 %v1013_v3 }
  0x88   : > { %986 = vmatprep.subr.bf16.mxu0 %v985_v4 }
  0x8a   : > { %1016 = vmatpush3.bf16.msra.mxu1 %v1013_v3 }
  0x8b   : > { %988 = vmatpush1.bf16.msra.mxu0 %v987_v9  ;;  %1018 = vmatprep.subr.bf16.mxu1 %v1017_v10 }
  0x8e   : > { %384 = vmatmul.mubr.f32.vlgmr.msra.gmra.mrb[0].mxu0 %v250_v49  ;;  %1020 = vmatpush3.bf16.msra.mxu1 %v1017_v10 }
  0x8f   : > { %389 = vmatprep.mubr.f32.mxu0 %v1357_v7 }
  0x91   : > { %930 = vmatmul.mubr.f32.vlgmr.msra.gmra.mrb[0].mxu1 %v251_v11 }
  0x92   : > { %390 = vmatmul.mubr.f32.gmra.mrb[2].mxu0 %v251_v11  ;;  %932 = vmatprep.mubr.f32.mxu1 %v252_v12 }
  0x93   : > { %395 = vmatprep.mubr.f32.mxu0 %v1357_v7 }
  0x95   : > { %933 = vmatmul.mubr.f32.gmra.mrb[2].mxu1 %v253_v13 }
  0x96   : > { %396 = vmatmul.mubr.f32.gmra.mrb[4].mxu0 %v252_v12 }
  0x97   : > { %401 = vmatprep.mubr.f32.mxu0 %v1357_v7  ;;  %v315_v7 = vrot.slane %v302_v17, %v314_v20 }
  0x9a   : > { %402 = vmatmul.mubr.f32.gmra.mrb[6].mxu0 %v253_v13 }
 0x161   : > { %v385_v24 = vpop.f32.mrb[0].mxu0 }
 0x162   : > { %v386_v26 = vadd.f32 %v385_v24, %v307_v21  ;;  %v387_v27 = vpop.f32.mrb[1].mxu0 }
 0x163   : > { %v388_v28 = vadd.f32 %v387_v27, %v311_v22 }
 0x164   : > { %v510_v30 = vmul.f32 %v498_v23, %v386_v26  ;;  %v931_v31 = vpop.f32.mrb[0].mxu1 }
 0x165   : > { %v511_v32 = vmul.f32 %v502_v25, %v388_v28  ;;  %v391_v33 = vpop.f32.mrb[2].mxu0  ;;  %v480_v34 = vadd.f32 %v931_v31, %v315_v7  ;;  %v474_v35 = vpop.f32.mrb[1].mxu1 }
 0x166   : > { %522 = vst [vmem:[#allocation2] sm:$0xff] %v510_v30  ;;  %v392_v36 = vadd.f32 %v391_v33, %v307_v21  ;;  %v393_v37 = vpop.f32.mrb[3].mxu0  ;;  %v475_v38 = vadd.f32 %v474_v35, %v315_v7 }
 0x167   : > { %526 = vst [vmem:[#allocation3] sm:$0xff] %v511_v32  ;;  %v394_v39 = vadd.f32 %v393_v37, %v311_v22  ;;  %v515_v40 = vmul.f32 %v506_v29, %v480_v34 }
 0x168   : > { %v513_v41 = vmul.f32 %v498_v23, %v392_v36  ;;  %v512_v42 = vmul.f32 %v506_v29, %v475_v38  ;;  %v934_v43 = vpop.f32.mrb[2].mxu1 }
 0x169   : > { %v514_v44 = vmul.f32 %v502_v25, %v394_v39  ;;  %531 = vst [vmem:[#allocation4 + $0x8] sm:$0xff] %v515_v40  ;;  %v397_v45 = vpop.f32.mrb[4].mxu0  ;;  %v490_v46 = vadd.f32 %v934_v43, %v315_v7  ;;  %v484_v47 = vpop.f32.mrb[3].mxu1 }
 0x16a   : > { %523 = vst [vmem:[#allocation2 + $0x8] sm:$0xff] %v513_v41  ;;  %v398_v48 = vadd.f32 %v397_v45, %v307_v21  ;;  %530 = vst [vmem:[#allocation4] sm:$0xff] %v512_v42  ;;  %v399_v49 = vpop.f32.mrb[5].mxu0  ;;  %v485_v50 = vadd.f32 %v484_v47, %v315_v7 }
 0x16b   : > { %527 = vst [vmem:[#allocation3 + $0x8] sm:$0xff] %v514_v44  ;;  %v400_v51 = vadd.f32 %v399_v49, %v311_v22  ;;  %v521_v52 = vmul.f32 %v506_v29, %v490_v46 }
 0x16c   : > { %v516_v53 = vmul.f32 %v498_v23, %v398_v48  ;;  %v518_v54 = vmul.f32 %v506_v29, %v485_v50 }
 0x16d   : > { %v517_v55 = vmul.f32 %v502_v25, %v400_v51  ;;  %533 = vst [vmem:[#allocation4 + $0x18] sm:$0xff] %v521_v52  ;;  %v403_v56 = vpop.f32.mrb[6].mxu0 }
 0x16e   : > { %524 = vst [vmem:[#allocation2 + $0x10] sm:$0xff] %v516_v53  ;;  %v404_v57 = vadd.f32 %v403_v56, %v307_v21  ;;  %532 = vst [vmem:[#allocation4 + $0x10] sm:$0xff] %v518_v54  ;;  %v405_v58 = vpop.f32.mrb[7].mxu0 }
 0x16f   : > { %528 = vst [vmem:[#allocation3 + $0x10] sm:$0xff] %v517_v55  ;;  %v406_v59 = vadd.f32 %v405_v58, %v311_v22 }
 0x170   : > { %v519_v60 = vmul.f32 %v498_v23, %v404_v57 }
 0x171   : > { %v520_v61 = vmul.f32 %v502_v25, %v406_v59 }
 0x172   : > { %525 = vst [vmem:[#allocation2 + $0x18] sm:$0xff] %v519_v60 }
 0x173   : > { %529 = vst [vmem:[#allocation3 + $0x18] sm:$0xff] %v520_v61 }
 0x174 PF: > { %v538_v62 = vld [vmem:[#allocation3] sm:$0xff]  ;;  %v539_v63 = vld [vmem:[#allocation3 + $0x8] sm:$0xff]  ;;  %s855_s8 = sshll.u32 %s1333_s21, 4  ;;  %vm621_vm0 = vcmask 261120   ;;  %v545_v25 = vld [vmem:[#allocation4 + $0x18] sm:$0xff]  ;;  %s859_s13 = sshll.u32 %s1333_s21, 1 }
 0x175   : > { %v1021_v1 = vpack.c.bf16 %v539_v63, %v538_v62  ;;  %s535_s12 = scalar_lea.vmem [#allocation2], %s855_s8  ;;  %v542_v21 = vld [vmem:[#allocation4] sm:$0xff]  ;;  %v543_v22 = vld [vmem:[#allocation4 + $0x8] sm:$0xff]  ;;  %v544_v23 = vld [vmem:[#allocation4 + $0x10] sm:$0xff]  ;;  %s860_s14 = sshll.u32 %s1337_s22, 2 }
 0x176   : > { %v540_v0 = vld [vmem:[#allocation3 + $0x10] sm:$0xff]  ;;  %v1029_v24 = vpack.c.bf16 %v543_v22, %v542_v21  ;;  %v1033_v7 = vpack.c.bf16 %v545_v25, %v544_v23  ;;  %s740_s23 = sadd.s32 %s860_s14, %s859_s13  ;;  %s743_s6 = sshll.u32 %s1584_s26, 4  ;;  %s1616_s6 = int_to_ptr.vmem [resolvable:$true] %s743_s6 }
 0x177   : > { %1022 = vmatprep.subr.bf16.mxu0 %v1021_v1  ;;  %s861_s4 = sshll.u32 %s740_s23, 7  ;;  %s1719_s11 = sld [smem:[#allocation20_spill]] }
 0x178   : > { %1024 = vmatpush3.bf16.xpose.msra.mxu0 %v1021_v1  ;;  %1030 = vmatprep.subr.bf16.mxu1 %v1029_v24  ;;  %s1622_s21 = scalar_lea.sflag [#allocation7], %s242_s15  ;;  %s1223_s22 = scalar_lea.vmem %s1616_s6, 256 }
 0x179   : > { %v536_v4 = vld [vmem:[%s535_s12] sm:$0xff]  ;;  %v537_v5 = vld [vmem:[%s535_s12 + $0x8] sm:$0xff]  ;;  %1032 = vmatpush3.bf16.msra.mxu1 %v1029_v24  ;;  %p1224_p7 = scmp.ne.s32.totalorder %s1616_s6, %s1223_s22  ;;  %p1720_p9 = scmp.ne.s32.totalorder %s1705_s5, 0 }
 0x17a   : > { %v541_v2 = vld [vmem:[#allocation3 + $0x18] sm:$0xff]  ;;  %943 = vmatprep.mubr.f32.mxu0 %v536_v4  ;;  %1034 = vmatprep.subr.bf16.mxu1 %v1033_v7  ;;  %s1358_s28 = smov [#allocation10]  }
 0x17b   : > { %v1025_v3 = vpack.c.bf16 %v541_v2, %v540_v0  ;;  %p1225_p11 = pnand %p1224_p7, %p1720_p9  ;;  %s1227_s30 = sshll.u32 %s1358_s28, 4  ;;  %s1228_s30 = int_to_ptr.vmem [resolvable:$false] %s1227_s30 }
 0x17c   : > { %s1229_s27 = scalar_lea.vmem %s1228_s30, 512  ;;  %p1230_p0 = scmp.lt.s32.totalorder %s1616_s6, %s1228_s30 }
 0x17d   : > { %1026 = vmatprep.subr.bf16.mxu0 %v1025_v3  ;;  %1036 = vmatpush3.bf16.msra.mxu1 %v1033_v7  ;;  %s1614_s7 = scalar_lea.hbm %s1719_s11, %s861_s4  ;;  %p1226_p13 = pneg %p1225_p11 }
 0x17e   : > { %p1231_p2 = scmp.lt.s32.totalorder %s1229_s27, %s1223_s22 }
 0x180   : > { %1028 = vmatpush3.bf16.xpose.msra.mxu0 %v1025_v3  ;;  %p1232_p5 = por %p1231_p2, %p1230_p0 }
 0x182   : > { %p1233_p8 = pnand %p1232_p5, %p1226_p13 }
 0x187   : > { %944 = vmatmul.mubr.f32.vlgmr.msra.gmra.mrb[0].mxu0 %v537_v5 }
 0x25a   : > { %v945_v6 = vpop.f32.mrb[0].mxu0 }
 0x25b   : > { %v612_v8 = vpop.f32.mrb[1].mxu0  ;;  %v625_v10 = vsel %vm621_vm0, %v945_v6, -inf }
 0x25c   : > { %v622_v9 = vsel %vm621_vm0, %v612_v8, -inf }
 0x25d   : > { %623 = vmax.xlane.f32.xlu0 %v622_v9 }
 0x261   : > { %626 = vmax.xlane.f32.xlu0 %v625_v10 }
 0x2ea   : > { %v624_v11 = vpop.xlane.xlu0 %623 }
 0x2eb   : > { %v628_v12 = vsub.f32 %v612_v8, %v624_v11 }
 0x2ed   : > { %v630_v13 = vmul.f32 1.442695, %v628_v12 }
 0x2ee   : > { %v627_v14 = vpop.xlane.xlu0 %626 }
 0x2ef   : > { %1157 = vpow2.f32 %v630_v13  ;;  %v629_v15 = vsub.f32 %v945_v6, %v627_v14 }
 0x2f1   : > { %v632_v16 = vmul.f32 1.442695, %v629_v15 }
 0x2f3   : > { %1159 = vpow2.f32 %v632_v16 }
 0x2f9   : > { %v1158_v17 = vpop.eup %1157 }
 0x2fa   : > { %v634_v18 = vsel %vm621_vm0, %v1158_v17, 0.0 }
 0x2fb   : > { %635 = vadd.xlane.f32.xlu1 %v634_v18 }
 0x2fd   : > { %v1160_v19 = vpop.eup %1159 }
 0x2fe   : > { %v637_v20 = vsel %vm621_vm0, %v1160_v19, 0.0 }
 0x2ff   : > { %638 = vadd.xlane.f32.xlu1 %v637_v20 }
 0x388   : > { %v636_v26 = vpop.xlane.xlu1 %635 }
 0x389   : > { %1161 = vrcp.f32 %v636_v26 }
 0x38c   : > { %v639_v27 = vpop.xlane.xlu1 %638 }
 0x38d   : > { %1163 = vrcp.f32 %v639_v27 }
 0x393   : > { %v1162_v28 = vpop.eup %1161 }
 0x394   : > { %v642_v29 = vmul.f32 %v1162_v28, %v1158_v17 }
 0x396   : > { %954 = vmatprep.mubr.msk.f32.mxu1 %vm621_vm0, %v642_v29 }
 0x397   : > { %v1164_v30 = vpop.eup %1163 }
 0x398   : > { %v643_v31 = vmul.f32 %v1164_v30, %v1160_v19 }
 0x39a   : > { %955 = vmatmul.mubr.msk.f32.vlgmr.msra.gmra.mrb[0].mxu1 %vm621_vm0, %v643_v31 }
 0x46d   : > { %v956_v32 = vpop.f32.mrb[0].mxu1 }
 0x46e   : > { %726 = vst [vmem:[%s1584_s26 + $0x8] sm:$0xff] %v956_v32  ;;  %v716_v33 = vpop.f32.mrb[1].mxu1 }
 0x46f   : > { %725 = vst [vmem:[%s1584_s26] sm:$0xff] %v716_v33 }
 0x470   : > { %1236 = shalt.err (!%p1233_p8)
}
 0x471   : > { %s1237_s15 = scalar_lea.hbm %s1614_s7, 256  ;;  %s1241_s8 = scalar_lea.hbm %s1719_s11, 1024 }
 0x472   : > { %p1238_p12 = scmp.ne.s32.totalorder %s1614_s7, %s1237_s15  ;;  %p1242_p10 = scmp.lt.u32.totalorder %s1614_s7, %s1719_s11 }
 0x473   : > { %p1243_p3 = scmp.lt.u32.totalorder %s1241_s8, %s1237_s15  ;;  %p1245_p7 = scmp.lt.u32.totalorder %s1237_s15, %s1614_s7 }
 0x474   : > { %p1239_p1 = pnand %p1238_p12, %p1720_p9 }
 0x475   : > { %p1244_p4 = por %p1243_p3, %p1242_p10 }
 0x476   : > { %p1240_p6 = pneg %p1239_p1 }
 0x477   : > { %p1246_p11 = por %p1245_p7, %p1244_p4 }
 0x479   : > { %p1247_p13 = pnand %p1246_p11, %p1240_p6 }
 0x47b   : > { %1250 = shalt.err (!%p1247_p13)
}
 0x47c   : > { %s1359_s14 = smov 128   ;;  %s1360_s23 = smov 8  }
 0x47d   : > { %1043 = dma.vmem_to_hbm [thread:$0]  (%p1720_p9), %s1616_s6, 256, %s1614_s7, %s1622_s21, %s1359_s14, %s1359_s14, %s1360_s23  }
 0x47e PF: > { %s1721_s4 = sld [smem:[#allocation14_spill]]  ;;  %s1722_s10 = sld [smem:[#allocation16_spill]] }
 0x47f   : > { %p1060_p0 = scmp.ge.s32.totalorder %s1349_s25, 2 }
 0x484   : > { %s758_s9 = sand.u32 1, %s1721_s4   ;;  %p1723_p2 = scmp.ne.s32.totalorder %s1722_s10, 0 }
 0x485   : > { %s759_s22 = scalar_lea.sflag [#allocation7], %s758_s9 }
 0x486   : > { %p1054_p5 = pnand %p1060_p0, %p1723_p2 }
 0x488   : > { %1304 = dma.done.wait (!%p1054_p5), %s759_s22, 256  }
 0x489   : > { %1306 = vsyncadd (!%p1054_p5), %s759_s22, 4294967040  ;;  %s21_s25 = sadd.s32 1, %s1349_s25   ;;  %s1724_s21 = sld [smem:[#allocation15_spill]] }
 0x48a   : > { %p18_p8 = scmp.ge.s32.totalorder %s21_s25, 6   ;;  %s1725_s23 = sld [smem:[#allocation17_spill]] }
 0x48b   : > { %s1726_s5 = sld [smem:[#allocation18_spill]]  ;;  %s1727_s15 = smov %s1313_s16 }
 0x48c   : > { %s1728_s16 = smov %s1317_s17  ;;  %s1729_s17 = smov %s1523_s18 }
 0x48d   : > { %s1730_s18 = smov %s1325_s19  ;;  %s1731_s19 = smov %s1329_s20 }
 0x48e   : > { %s1732_s20 = smov %s1518_s29  ;;  %s1733_s22 = smov %s1345_s24 }
 0x48f   :  { %20 = sbr.rel (!%p18_p8) target bundleno = 13 (0xd), region = 90 }
 0x491   : > { %s1734_s24 = smov %s1726_s5 }
 0x496   :  { %764 = vsyncpa [#allocation6], 1 }
 0x497   :  { %766 = vsyncpa [#allocation6 + $0x1], 1 }
 0x498   :  { %767 = vsyncpa [#allocation9], 1 }
 0x499   :  { %768 = vsyncpa [#allocation7], 1 }
 0x49a   :  { %770 = vsyncpa [#allocation7 + $0x1], 1 }

</bundles_post_ra>
